<compile_context>
chip_gen: v7x
topology: tpu7x:2x2x1
jax: 0.10.0
libtpu: 0.0.40
codegen_flags: <defaults>
</compile_context>

<pallas_src>
import functools

import jax
import jax.numpy as jnp
from jax.experimental import pallas as pl
from jax.experimental.pallas import tpu as pltpu

HEAD_W = 128   # lane-dense fused head width (multiple of 128)
HIDDEN = 128   # nn.Linear(state_dim, 128) / nn.Linear(128, 128)


# --------------------------------------------------------------------------
# Kernel
# --------------------------------------------------------------------------
def dueling_q_kernel(x_ref, w1_ref, w2_ref, wq_ref, b_ref, q_ref):
    x = x_ref[...]                                   # (bt, S) f32
    bt, s = x.shape
    hidden = w2_ref.shape[0]

    b1 = b_ref[0:1, :]                               # (1, 128) f32
    b2 = b_ref[1:2, :]
    bq = b_ref[2:3, :]

    # ---- fc1 + relu: K = S (4) badly underfills the MXU -> VPU outer product:
    # h1 = b1 + sum_k x[:, k] (outer) w1[k, :]
    h1 = jnp.broadcast_to(b1, (bt, hidden))
    for k in range(s):                               # static, tiny unrolled loop
        h1 = h1 + x[:, k:k + 1] * w1_ref[k:k + 1, :]
    h1 = jnp.maximum(h1, 0.0)

    # ---- fc2 + relu: 128x128 on the MXU, bf16 operands, f32 accumulation.
    h2 = jnp.dot(h1.astype(jnp.bfloat16), w2_ref[...],
                 preferred_element_type=jnp.float32) + b2
    h2 = jnp.maximum(h2, 0.0)

    # ---- fused dueling head: the V + (A - mean A) combine is already folded
    # into wq / bq, so this single lane-dense matmul emits Q directly.
    # Columns >= action_dim are exactly zero (zero-padded folded weights).
    q_ref[...] = jnp.dot(h2.astype(jnp.bfloat16), wq_ref[...],
                         preferred_element_type=jnp.float32) + bq


# --------------------------------------------------------------------------
# Host-side parameter fusion
# --------------------------------------------------------------------------
def fuse_head_params(params):
    """Fold the dueling combine into one lane-dense (H, 128) bf16 head weight.

    Q_j = (wa_j - mean_k wa_k + wv) . h2 + (ba_j - mean_k ba_k + bv)
    """
    w1, b1, w2, b2, wv, bv, wa, ba = params
    hidden = w2.shape[1]
    action_dim = wa.shape[1]
    assert hidden == HIDDEN and HEAD_W == HIDDEN
    assert action_dim <= HEAD_W

    # Fold combine (done in f32, then cast the MXU weights to bf16).
    wq_real = wa - jnp.mean(wa, axis=1, keepdims=True) + wv      # (H, A)
    bq_real = ba - jnp.mean(ba, axis=1, keepdims=True) + bv      # (1, A)

    wq = jnp.zeros((hidden, HEAD_W), jnp.float32).at[:, :action_dim].set(wq_real)
    bq = jnp.zeros((1, HEAD_W), jnp.float32).at[:, :action_dim].set(bq_real)

    # Stack the three biases into a single (8, 128) f32 operand (fewer DMA
    # descriptors per grid step; rows 3..7 are padding).
    biases = jnp.zeros((8, HEAD_W), jnp.float32)
    biases = biases.at[0:1, :].set(b1).at[1:2, :].set(b2).at[2:3, :].set(bq)

    fused = (w1.astype(jnp.float32),          # (S, H)  f32, VPU path
             w2.astype(jnp.bfloat16),         # (H, H)  bf16, MXU
             wq.astype(jnp.bfloat16),         # (H, 128) bf16, MXU
             biases)                          # (8, 128) f32
    return fused, action_dim


# --------------------------------------------------------------------------
# Wrapper
# --------------------------------------------------------------------------
def dueling_q_forward(x, fused_params, action_dim, *,
                      batch_tile=2048, single_block_max=512):
    w1, w2, wq, biases = fused_params
    B, S = x.shape
    hidden = w2.shape[0]

    if B <= single_block_max:
        # Tiny / latency-bound case: one grid step, no padding overhead.
        bt = B
        x_in = x
    else:
        # Large batch: big tiles to amortize per-step overhead, but keep the
        # grid >= 2 steps so v7x's second TensorCore gets work.
        bt = min(batch_tile, 256 * pl.cdiv(pl.cdiv(B, 2), 256))
        b_pad = bt * pl.cdiv(B, bt)
        x_in = jnp.pad(x, ((0, b_pad - B), (0, 0)))
    Bp = x_in.shape[0]
    grid = (Bp // bt,)

    const2 = lambda i: (0, 0)   # weights/biases stay VMEM-resident across grid

    flops = 2 * Bp * (S * hidden + hidden * hidden + hidden * HEAD_W)
    bytes_accessed = (4 * (x_in.size + w1.size + biases.size + Bp * HEAD_W)
                      + 2 * (w2.size + wq.size))
    cost = pl.CostEstimate(flops=int(flops), transcendentals=0,
                           bytes_accessed=int(bytes_accessed))

    q_slab = pl.pallas_call(
        dueling_q_kernel,
        out_shape=jax.ShapeDtypeStruct((Bp, HEAD_W), jnp.float32),
        grid=grid,
        in_specs=[
            pl.BlockSpec((bt, S), lambda i: (i, 0)),
            pl.BlockSpec(w1.shape, const2),
            pl.BlockSpec(w2.shape, const2),
            pl.BlockSpec(wq.shape, const2),
            pl.BlockSpec(biases.shape, const2),
        ],
        out_specs=pl.BlockSpec((bt, HEAD_W), lambda i: (i, 0)),
        compiler_params=pltpu.CompilerParams(
            dimension_semantics=("parallel",)),
        cost_estimate=cost,
    )(x_in, w1, w2, wq, biases)

    # Lane-dense slab -> real Q values. Columns >= action_dim are zero by
    # construction; consumers may also read the slab layout directly to avoid
    # this extra slice on the mem-bound large-batch path.
    return q_slab[:B, :action_dim]


# --------------------------------------------------------------------------
# Init / reference
# --------------------------------------------------------------------------
def init_params(key, state_dim, action_dim, hidden=HIDDEN):
    ks = jax.random.split(key, 8)

    def lin(kw, kb, fan_in, fan_out):
        bound = 1.0 / jnp.sqrt(fan_in)
        w = jax.random.uniform(kw, (fan_in, fan_out), jnp.float32, -bound, bound)
        b = jax.random.uniform(kb, (1, fan_out), jnp.float32, -bound, bound)
        return w, b

    w1, b1 = lin(ks[0], ks[1], state_dim, hidden)
    w2, b2 = lin(ks[2], ks[3], hidden, hidden)
    wv, bv = lin(ks[4], ks[5], hidden, 1)
    wa, ba = lin(ks[6], ks[7], hidden, action_dim)
    return (w1, b1, w2, b2, wv, bv, wa, ba)


def reference_forward(x, params):
    w1, b1, w2, b2, wv, bv, wa, ba = params
    hp = jax.lax.Precision.HIGHEST
    h1 = jnp.maximum(jnp.dot(x, w1, precision=hp) + b1, 0.0)
    h2 = jnp.maximum(jnp.dot(h1, w2, precision=hp) + b2, 0.0)
    value = jnp.dot(h2, wv, precision=hp) + bv
    adv = jnp.dot(h2, wa, precision=hp) + ba
    return value + (adv - adv.mean(axis=1, keepdims=True))


if __name__ == "__main__":
    key = jax.random.PRNGKey(0)
    k_params, k_x = jax.random.split(key)

    batch = 8
    state_dim = 4      # CartPole-v1 observation dim
    action_dim = 2     # CartPole-v1 action dim

    params = init_params(k_params, state_dim, action_dim)
    fused_params, A = fuse_head_params(params)
    x = jax.random.normal(k_x, (batch, state_dim), jnp.float32)

    q = dueling_q_forward(x, fused_params, A)
    q = jax.block_until_ready(q)

    q_ref = reference_forward(x, params)
    assert q.shape == (batch, action_dim)
    # bf16 MXU path -> loosened tolerance vs. the f32 reference.
    assert jnp.allclose(q, q_ref, atol=2e-2, rtol=2e-2), "mismatch vs JAX reference"

    print("KERNEL_OK")
</pallas_src>

<mosaic_0001>
module attributes {stable_mosaic.version = 11 : i64} {
  func.func @dueling_q_kernel(%arg0: i32, %arg1: memref<8x4xf32, #tpu.memory_space<vmem>>, %arg2: memref<4x128xf32, #tpu.memory_space<vmem>>, %arg3: memref<128x128xbf16, #tpu.memory_space<vmem>>, %arg4: memref<128x128xbf16, #tpu.memory_space<vmem>>, %arg5: memref<8x128xf32, #tpu.memory_space<vmem>>, %arg6: memref<8x128xf32, #tpu.memory_space<vmem>>) attributes {dimension_semantics = [#tpu.dimension_semantics<parallel>], iteration_bounds = array<i64: 1>, scalar_prefetch = 0 : i64, scratch_operands = 0 : i64, tpu.core_type = #tpu.core_type<tc>, window_params = [{transform_indices = @transform_0, window_bounds = array<i64: 8, 4>}, {pipeline_mode = #tpu.pipeline_mode<synchronous>, transform_indices = @transform_1, window_bounds = array<i64: 4, 128>}, {pipeline_mode = #tpu.pipeline_mode<synchronous>, transform_indices = @transform_2, window_bounds = array<i64: 128, 128>}, {pipeline_mode = #tpu.pipeline_mode<synchronous>, transform_indices = @transform_3, window_bounds = array<i64: 128, 128>}, {pipeline_mode = #tpu.pipeline_mode<synchronous>, transform_indices = @transform_4, window_bounds = array<i64: 8, 128>}, {transform_indices = @transform_5, window_bounds = array<i64: 8, 128>}]} {
    %c0 = arith.constant 0 : index
    %c0_0 = arith.constant 0 : index
    %0 = vector.load %arg1[%c0, %c0_0] : memref<8x4xf32, #tpu.memory_space<vmem>>, vector<8x4xf32>
    %c0_1 = arith.constant 0 : index
    %c0_2 = arith.constant 0 : index
    %1 = vector.load %arg5[%c0_1, %c0_2] : memref<8x128xf32, #tpu.memory_space<vmem>>, vector<1x128xf32>
    %c1 = arith.constant 1 : index
    %c0_3 = arith.constant 0 : index
    %2 = vector.load %arg5[%c1, %c0_3] : memref<8x128xf32, #tpu.memory_space<vmem>>, vector<1x128xf32>
    %c2 = arith.constant 2 : index
    %c0_4 = arith.constant 0 : index
    %3 = vector.load %arg5[%c2, %c0_4] : memref<8x128xf32, #tpu.memory_space<vmem>>, vector<1x128xf32>
    %4 = vector.shape_cast %1 : vector<1x128xf32> to vector<1x128xf32>
    %5 = vector.broadcast %4 : vector<1x128xf32> to vector<8x128xf32>
    %6 = vector.extract_strided_slice %0 {offsets = [0, 0], sizes = [8, 1], strides = [1, 1]} : vector<8x4xf32> to vector<8x1xf32>
    %c0_5 = arith.constant 0 : index
    %c0_6 = arith.constant 0 : index
    %7 = vector.load %arg2[%c0_5, %c0_6] : memref<4x128xf32, #tpu.memory_space<vmem>>, vector<1x128xf32>
    %8 = vector.broadcast %6 : vector<8x1xf32> to vector<8x128xf32>
    %9 = vector.broadcast %7 : vector<1x128xf32> to vector<8x128xf32>
    %10 = arith.mulf %8, %9 : vector<8x128xf32>
    %11 = arith.addf %5, %10 : vector<8x128xf32>
    %12 = vector.extract_strided_slice %0 {offsets = [0, 1], sizes = [8, 1], strides = [1, 1]} : vector<8x4xf32> to vector<8x1xf32>
    %c1_7 = arith.constant 1 : index
    %c0_8 = arith.constant 0 : index
    %13 = vector.load %arg2[%c1_7, %c0_8] : memref<4x128xf32, #tpu.memory_space<vmem>>, vector<1x128xf32>
    %14 = vector.broadcast %12 : vector<8x1xf32> to vector<8x128xf32>
    %15 = vector.broadcast %13 : vector<1x128xf32> to vector<8x128xf32>
    %16 = arith.mulf %14, %15 : vector<8x128xf32>
    %17 = arith.addf %11, %16 : vector<8x128xf32>
    %18 = vector.extract_strided_slice %0 {offsets = [0, 2], sizes = [8, 1], strides = [1, 1]} : vector<8x4xf32> to vector<8x1xf32>
    %c2_9 = arith.constant 2 : index
    %c0_10 = arith.constant 0 : index
    %19 = vector.load %arg2[%c2_9, %c0_10] : memref<4x128xf32, #tpu.memory_space<vmem>>, vector<1x128xf32>
    %20 = vector.broadcast %18 : vector<8x1xf32> to vector<8x128xf32>
    %21 = vector.broadcast %19 : vector<1x128xf32> to vector<8x128xf32>
    %22 = arith.mulf %20, %21 : vector<8x128xf32>
    %23 = arith.addf %17, %22 : vector<8x128xf32>
    %24 = vector.extract_strided_slice %0 {offsets = [0, 3], sizes = [8, 1], strides = [1, 1]} : vector<8x4xf32> to vector<8x1xf32>
    %c3 = arith.constant 3 : index
    %c0_11 = arith.constant 0 : index
    %25 = vector.load %arg2[%c3, %c0_11] : memref<4x128xf32, #tpu.memory_space<vmem>>, vector<1x128xf32>
    %26 = vector.broadcast %24 : vector<8x1xf32> to vector<8x128xf32>
    %27 = vector.broadcast %25 : vector<1x128xf32> to vector<8x128xf32>
    %28 = arith.mulf %26, %27 : vector<8x128xf32>
    %29 = arith.addf %23, %28 : vector<8x128xf32>
    %cst = arith.constant 0.000000e+00 : f32
    %30 = vector.broadcast %cst : f32 to vector<8x128xf32>
    %31 = arith.maximumf %29, %30 : vector<8x128xf32>
    %32 = arith.truncf %31 : vector<8x128xf32> to vector<8x128xbf16>
    %c0_12 = arith.constant 0 : index
    %c0_13 = arith.constant 0 : index
    %33 = vector.load %arg3[%c0_12, %c0_13] : memref<128x128xbf16, #tpu.memory_space<vmem>>, vector<128x128xbf16>
    %cst_14 = arith.constant dense<0.000000e+00> : vector<8x128xf32>
    %34 = tpu.matmul %32, %33, %cst_14 {dimension_numbers = #tpu.dot_dimension_numbers<[1], [0], [0], [1], [0, 0, 1, 1], [], []>} : vector<8x128xbf16>, vector<128x128xbf16>, vector<8x128xf32> -> vector<8x128xf32>
    %35 = vector.broadcast %2 : vector<1x128xf32> to vector<8x128xf32>
    %36 = arith.addf %34, %35 : vector<8x128xf32>
    %cst_15 = arith.constant 0.000000e+00 : f32
    %37 = vector.broadcast %cst_15 : f32 to vector<8x128xf32>
    %38 = arith.maximumf %36, %37 : vector<8x128xf32>
    %39 = arith.truncf %38 : vector<8x128xf32> to vector<8x128xbf16>
    %c0_16 = arith.constant 0 : index
    %c0_17 = arith.constant 0 : index
    %40 = vector.load %arg4[%c0_16, %c0_17] : memref<128x128xbf16, #tpu.memory_space<vmem>>, vector<128x128xbf16>
    %cst_18 = arith.constant dense<0.000000e+00> : vector<8x128xf32>
    %41 = tpu.matmul %39, %40, %cst_18 {dimension_numbers = #tpu.dot_dimension_numbers<[1], [0], [0], [1], [0, 0, 1, 1], [], []>} : vector<8x128xbf16>, vector<128x128xbf16>, vector<8x128xf32> -> vector<8x128xf32>
    %42 = vector.broadcast %3 : vector<1x128xf32> to vector<8x128xf32>
    %43 = arith.addf %41, %42 : vector<8x128xf32>
    %c0_19 = arith.constant 0 : index
    %c0_20 = arith.constant 0 : index
    %44 = vector.load %arg6[%c0_19, %c0_20] : memref<8x128xf32, #tpu.memory_space<vmem>>, vector<8x128xf32>
    tpu.vector_store %arg6[%c0_19, %c0_20], %43 {strides = array<i32>} : memref<8x128xf32, #tpu.memory_space<vmem>>, vector<8x128xf32>,
    return
  }
  func.func @transform_0(%arg0: i32) -> (i32, i32) {
    %c0_i32 = arith.constant 0 : i32
    %c0_i32_0 = arith.constant 0 : i32
    return %arg0, %c0_i32 : i32, i32
  }
  func.func @transform_1(%arg0: i32) -> (i32, i32) {
    %c0_i32 = arith.constant 0 : i32
    %c0_i32_0 = arith.constant 0 : i32
    %c0_i32_1 = arith.constant 0 : i32
    return %c0_i32, %c0_i32_0 : i32, i32
  }
  func.func @transform_2(%arg0: i32) -> (i32, i32) {
    %c0_i32 = arith.constant 0 : i32
    %c0_i32_0 = arith.constant 0 : i32
    %c0_i32_1 = arith.constant 0 : i32
    return %c0_i32, %c0_i32_0 : i32, i32
  }
  func.func @transform_3(%arg0: i32) -> (i32, i32) {
    %c0_i32 = arith.constant 0 : i32
    %c0_i32_0 = arith.constant 0 : i32
    %c0_i32_1 = arith.constant 0 : i32
    return %c0_i32, %c0_i32_0 : i32, i32
  }
  func.func @transform_4(%arg0: i32) -> (i32, i32) {
    %c0_i32 = arith.constant 0 : i32
    %c0_i32_0 = arith.constant 0 : i32
    %c0_i32_1 = arith.constant 0 : i32
    return %c0_i32, %c0_i32_0 : i32, i32
  }
  func.func @transform_5(%arg0: i32) -> (i32, i32) {
    %c0_i32 = arith.constant 0 : i32
    %c0_i32_0 = arith.constant 0 : i32
    return %arg0, %c0_i32 : i32, i32
  }
}

</mosaic_0001>

<bundles_post_ra>
// kernel: tpu_custom_call.1
= control target key start
LH: loop header
LB: loop body
LE: loop exit
PB: predicated region body
PF: predicated region fallthrough
CT: control target
= control target key end

     0   :  { %10 = vsyncpa [#allocation3], 0  ;;  %s644_s0 = inlined_call_operand.vmem [shape: f32[8,4], index: 0, kind: input, shape index: {}]   ;;  %s645_s1 = inlined_call_operand.vmem [shape: f32[4,128], index: 1, kind: input, shape index: {}]   ;;  %s646_s2 = inlined_call_operand.hbm [shape: bf16[128,128], index: 2, kind: input, shape index: {}]   ;;  %s647_s3 = inlined_call_operand.hbm [shape: bf16[128,128], index: 3, kind: input, shape index: {}]   ;;  %s648_s4 = inlined_call_operand.vmem [shape: f32[8,128], index: 4, kind: input, shape index: {}]   ;;  %s649_s5 = inlined_call_operand.hbm [shape: f32[8,128], index: 5, kind: output, shape index: {}]  }
   0x1   :  { %11 = vsyncpa [#allocation6], 0 }
   0x2   :  { %12 = vsyncpa [#allocation4], 0  ;;  %s525_s18 = smov [#allocation2]   ;;  %s453_s22 = scalar_lea.hbm %s646_s2, 1024 }
   0x3   :  { %s22_s19 = sshll.u32 %s525_s18, 4  ;;  %p454_p0 = scmp.ne.s32.totalorder %s646_s2, %s453_s22  ;;  %s23_s19 = int_to_ptr.vmem [resolvable:$true] %s22_s19 }
   0x4   :  { %p457_p1 = scmp.lt.u32.totalorder %s453_s22, %s646_s2 }
   0x6   :  { %p459_p2 = pnand %p457_p1, %p454_p0 }
   0x8   :  { %462 = shalt.err (!%p459_p2)
}
   0x9   :  { %s463_s27 = scalar_lea.vmem %s23_s19, 1024  ;;  %p468_p4 = scmp.lt.s32.totalorder %s23_s19, %s23_s19 }
   0xa   :  { %p464_p3 = scmp.ne.s32.totalorder %s23_s19, %s463_s27  ;;  %p469_p5 = scmp.lt.s32.totalorder %s463_s27, %s463_s27 }
   0xc   :  { %p470_p6 = por %p469_p5, %p468_p4 }
   0xe   :  { %p471_p7 = pnand %p470_p6, %p464_p3 }
  0x10   :  { %474 = shalt.err (!%p471_p7)
}
  0x11   :  { %s526_s28 = smov 64   ;;  %s527_s29 = smov 4  }
  0x12   :  { %28 = dma.hbm_to_vmem [thread:$0]  %s646_s2, 1024, %s23_s19, [#allocation3], %s526_s28, %s526_s28, %s527_s29  }
  0x13   :  { %s528_s7 = smov [#allocation5]   ;;  %s475_s11 = scalar_lea.hbm %s647_s3, 1024 }
  0x14   :  { %s34_s8 = sshll.u32 %s528_s7, 4  ;;  %p476_p8 = scmp.ne.s32.totalorder %s647_s3, %s475_s11  ;;  %s35_s8 = int_to_ptr.vmem [resolvable:$true] %s34_s8 }
  0x15   :  { %p479_p9 = scmp.lt.u32.totalorder %s475_s11, %s647_s3 }
  0x17   :  { %p481_p10 = pnand %p479_p9, %p476_p8 }
  0x19   :  { %484 = shalt.err (!%p481_p10)
}
  0x1a   :  { %s485_s16 = scalar_lea.vmem %s35_s8, 1024  ;;  %p490_p12 = scmp.lt.s32.totalorder %s35_s8, %s35_s8 }
  0x1b   :  { %p486_p11 = scmp.ne.s32.totalorder %s35_s8, %s485_s16  ;;  %p491_p13 = scmp.lt.s32.totalorder %s485_s16, %s485_s16 }
  0x1d   :  { %p492_p0 = por %p491_p13, %p490_p12 }
  0x1f   :  { %p493_p1 = pnand %p492_p0, %p486_p11 }
  0x21   :  { %496 = shalt.err (!%p493_p1)
}
  0x22   :  { %40 = dma.hbm_to_vmem [thread:$0]  %s647_s3, 1024, %s35_s8, [#allocation6], %s526_s28, %s526_s28, %s527_s29  }
  0x23   :  { %519 = dma.done.wait [#allocation3], 1024  }
  0x24   :  { %520 = vsyncadd [#allocation3], 4294966272 }
  0x25   :  { %521 = dma.done.wait [#allocation6], 1024  }
  0x26   :  { %522 = vsyncadd [#allocation6], 4294966272  ;;  %v529_v0 = vmov 0   ;;  %v530_v1 = vmov 2   ;;  %v531_v2 = vmov 0.0   ;;  %v50_v3 = vld [vmem:[%s644_s0] sm:$0xff] }
  0x27   :  { %432 = vset.pattern.permute.xlu0 %v529_v0  ;;  %434 = vset.pattern.permute.xlu1 %v530_v1  ;;  %v437_v4 = vld [vmem:[#allocation2] sm:$0xff]   ;;  %v438_v5 = vld [vmem:[#allocation2 + $0x8] sm:$0xff]   ;;  %v532_v6 = vmov 1   ;;  %v533_v7 = vmov 3   ;;  %v439_v8 = vld [vmem:[#allocation2 + $0x10] sm:$0xff]   ;;  %vm534_vm0 = vmmov 0  }
  0x28   :  { %381 = vmatprep.subr.bf16.mxu0 %v531_v2  ;;  %401 = vmatprep.subr.bf16.mxu1 %v531_v2  ;;  %v440_v9 = vld [vmem:[#allocation2 + $0x18] sm:$0xff]   ;;  %v441_v10 = vld [vmem:[#allocation2 + $0x20] sm:$0xff]   ;;  %v442_v12 = vld [vmem:[#allocation2 + $0x28] sm:$0xff]   ;;  %s535_s6 = smov [#allocation7]  }
  0x29   :  { %61 = vperm.xlu0 %432, %v50_v3   ;;  %83 = vperm.xlu1 %434, %v50_v3   ;;  %v445_v11 = vld [vmem:[#allocation5] sm:$0xff]   ;;  %v446_v13 = vld [vmem:[#allocation5 + $0x8] sm:$0xff]   ;;  %v443_v14 = vld [vmem:[#allocation2 + $0x30] sm:$0xff]   ;;  %s330_s7 = sshll.u32 %s535_s6, 4  ;;  %s331_s7 = int_to_ptr.vmem [resolvable:$true] %s330_s7 }
  0x2a   :  { %382 = vmatpush3.bf16.msra.mxu0 %v437_v4  ;;  %397 = vmatprep.mubr.msk.bf16.mxu0 %vm534_vm0, %v531_v2  ;;  %v447_v15 = vld [vmem:[#allocation5 + $0x10] sm:$0xff]   ;;  %v444_v16 = vld [vmem:[#allocation2 + $0x38] sm:$0xff]   ;;  %v449_v18 = vld [vmem:[#allocation5 + $0x20] sm:$0xff]   ;;  %s497_s8 = scalar_lea.vmem %s331_s7, 128  ;;  %p502_p3 = scmp.lt.s32.totalorder %s331_s7, %s331_s7 }
  0x2b   :  { %383 = vmatprep.subr.bf16.mxu0 %v531_v2  ;;  %417 = vmatprep.mubr.msk.bf16.mxu1 %vm534_vm0, %v531_v2  ;;  %v448_v17 = vld [vmem:[#allocation5 + $0x18] sm:$0xff]   ;;  %v450_v19 = vld [vmem:[#allocation5 + $0x28] sm:$0xff]   ;;  %v451_v39 = vld [vmem:[#allocation5 + $0x30] sm:$0xff]   ;;  %p498_p2 = scmp.ne.s32.totalorder %s331_s7, %s497_s8  ;;  %p503_p4 = scmp.lt.s32.totalorder %s497_s8, %s497_s8 }
  0x2c   :  { %402 = vmatpush3.bf16.msra.mxu1 %v445_v11  ;;  %v341_v20 = vld [vmem:[%s645_s1] ss:$0 sm:$0xff]  ;;  %v342_v25 = vld [vmem:[%s645_s1 + $0x1] ss:$0 sm:$0xff]  ;;  %v343_v26 = vld [vmem:[%s645_s1 + $0x2] ss:$0 sm:$0xff] }
  0x2d   :  { %433 = vset.pattern.permute.xlu0 %v532_v6  ;;  %435 = vset.pattern.permute.xlu1 %v533_v7  ;;  %v340_v24 = vld [vmem:[%s648_s4] ss:$0 sm:$0xff]  ;;  %v344_v28 = vld [vmem:[%s645_s1 + $0x3] ss:$0 sm:$0xff]  ;;  %v345_v41 = vld [vmem:[%s648_s4 + $0x1] ss:$0 sm:$0xff]  ;;  %p504_p5 = por %p503_p4, %p502_p3 }
  0x2e   :  { %72 = vperm.xlu0 %433, %v50_v3   ;;  %94 = vperm.xlu1 %435, %v50_v3   ;;  %v452_v40 = vld [vmem:[#allocation5 + $0x38] sm:$0xff]  }
  0x2f   :  { %384 = vmatpush3.bf16.msra.mxu0 %v438_v5  ;;  %403 = vmatprep.subr.bf16.mxu1 %v531_v2  ;;  %v354_v49 = vld [vmem:[%s648_s4 + $0x2] ss:$0 sm:$0xff]  ;;  %p505_p6 = pnand %p504_p5, %p498_p2 }
  0x30   :  { %385 = vmatprep.subr.bf16.mxu0 %v531_v2  ;;  %404 = vmatpush3.bf16.msra.mxu1 %v446_v13 }
  0x31   :  { %405 = vmatprep.subr.bf16.mxu1 %v531_v2 }
  0x32   :  { %436 = vset.pattern.permute.xlu0 %v533_v7 }
  0x33   :  { %386 = vmatpush3.bf16.msra.mxu0 %v439_v8 }
  0x34   :  { %387 = vmatprep.subr.bf16.mxu0 %v531_v2  ;;  %406 = vmatpush3.bf16.msra.mxu1 %v447_v15 }
  0x35   :  { %407 = vmatprep.subr.bf16.mxu1 %v531_v2 }
  0x37   :  { %388 = vmatpush3.bf16.msra.mxu0 %v440_v9 }
  0x38   :  { %389 = vmatprep.subr.bf16.mxu0 %v531_v2  ;;  %408 = vmatpush3.bf16.msra.mxu1 %v448_v17 }
  0x39   :  { %409 = vmatprep.subr.bf16.mxu1 %v531_v2 }
  0x3b   :  { %390 = vmatpush3.bf16.msra.mxu0 %v441_v10 }
  0x3c   :  { %391 = vmatprep.subr.bf16.mxu0 %v531_v2  ;;  %410 = vmatpush3.bf16.msra.mxu1 %v449_v18 }
  0x3d   :  { %411 = vmatprep.subr.bf16.mxu1 %v531_v2 }
  0x3f   :  { %392 = vmatpush3.bf16.msra.mxu0 %v442_v12 }
  0x40   :  { %393 = vmatprep.subr.bf16.mxu0 %v531_v2  ;;  %412 = vmatpush3.bf16.msra.mxu1 %v450_v19 }
  0x41   :  { %413 = vmatprep.subr.bf16.mxu1 %v531_v2 }
  0x43   :  { %394 = vmatpush3.bf16.msra.mxu0 %v443_v14 }
  0x44   :  { %395 = vmatprep.subr.bf16.mxu0 %v531_v2  ;;  %414 = vmatpush3.bf16.msra.mxu1 %v451_v39 }
  0x45   :  { %415 = vmatprep.subr.bf16.mxu1 %v531_v2 }
  0x47   :  { %396 = vmatpush3.bf16.msra.mxu0 %v444_v16 }
  0x48   :  { %416 = vmatpush3.bf16.msra.mxu1 %v452_v40 }
  0xa8   :  { %v62_v21 = vpop.permute.xlu0 %61  ;;  %v84_v22 = vpop.permute.xlu1 %83 }
  0xa9   :  { %v68_v23 = vmul.f32 %v341_v20, %v62_v21  ;;  %v90_v32 = vmul.f32 %v343_v26, %v84_v22 }
  0xab   :  { %v69_v30 = vadd.f32 %v340_v24, %v68_v23 }
  0xad   :  { %v73_v27 = vpop.permute.xlu0 %72  ;;  %v95_v29 = vpop.permute.xlu1 %94 }
  0xae   :  { %v79_v31 = vmul.f32 %v342_v25, %v73_v27  ;;  %v101_v34 = vmul.f32 %v344_v28, %v95_v29 }
  0xb0   :  { %v80_v33 = vadd.f32 %v79_v31, %v69_v30 }
  0xb2   :  { %v91_v35 = vadd.f32 %v90_v32, %v80_v33 }
  0xb4   :  { %v102_v36 = vadd.f32 %v101_v34, %v91_v35 }
  0xb6   :  { %v103_v37 = vmax.f32 %v102_v36, 0.0 }
  0xb8   :  { %v104_v38 = vpack.c.bf16 %v103_v37, %v103_v37 }
  0xba   :  { %398 = vmatmul.mubr.bf16.vlgmr.msra.gmra.mrb[0].mxu0 %v104_v38 }
 0x18d   :  { %v207_v42 = vpop.f32.mrb[0].mxu0 }
 0x18e   :  { %v208_v43 = vadd.f32 %v345_v41, %v207_v42  ;;  %v399_v44 = vpop.f32.mrb[1].mxu0 }
 0x18f   :  { %v210_v45 = vpop.f32.mrb[2].mxu0 }
 0x190   :  { %v213_v46 = vmax.f32 %v208_v43, 0.0  ;;  %v400_v47 = vpop.f32.mrb[3].mxu0 }
 0x192   :  { %v214_v48 = vpack.c.bf16 %v213_v46, %v213_v46 }
 0x194   :  { %418 = vmatmul.mubr.bf16.vlgmr.msra.gmra.mrb[0].mxu1 %v214_v48 }
 0x267   :  { %v317_v50 = vpop.f32.mrb[0].mxu1 }
 0x268   :  { %v318_v51 = vadd.f32 %v354_v49, %v317_v50  ;;  %v419_v52 = vpop.f32.mrb[1].mxu1 }
 0x269   :  { %v320_v53 = vpop.f32.mrb[2].mxu1 }
 0x26a   :  { %323 = vst [vmem:[#allocation7] sm:$0xff] %v318_v51  ;;  %v420_v54 = vpop.f32.mrb[3].mxu1 }
 0x26b   :  { %508 = shalt.err (!%p505_p6)
}
 0x26c   :  { %s509_s4 = scalar_lea.hbm %s649_s5, 128 }
 0x26d   :  { %p510_p7 = scmp.ne.s32.totalorder %s649_s5, %s509_s4  ;;  %p513_p8 = scmp.lt.u32.totalorder %s509_s4, %s649_s5 }
 0x26f   :  { %p515_p9 = pnand %p513_p8, %p510_p7 }
 0x271   :  { %518 = shalt.err (!%p515_p9)
}
 0x272   :  { %333 = dma.vmem_to_hbm [thread:$0]  %s331_s7, 128, %s649_s5, [#allocation4]  }
 0x273   :  { %523 = dma.done.wait [#allocation4], 128  }
 0x274   :  { %524 = vsyncadd [#allocation4], 4294967168 }
 0x275   :  { %337 = vsyncpa [#allocation3], 1 }
 0x276   :  { %338 = vsyncpa [#allocation6], 1 }
 0x277   :  { %339 = vsyncpa [#allocation4], 1 }

</bundles_post_ra>
